<compile_context>
chip_gen: v7x
topology: tpu7x:2x2x1
jax: 0.10.0
libtpu: 0.0.40
codegen_flags: <defaults>
</compile_context>

<pallas_src>
import functools
import math

import jax
import jax.numpy as jnp
import numpy as np
from jax.experimental import pallas as pl
from jax.experimental.pallas import tpu as pltpu

_LANES = 128
_SUBLANES = 8
_MAX_BLOCK_ROWS = 4032          # multiple of 72; (4032, 128) f32 tile ~= 2 MiB
_FAST_PATH_MAX_ELEMS = 32_768   # below this, plain fused XLA beats any kernel


def _mul_kernel(x_ref, c_ref, o_ref):
    # Pure same-shape elementwise multiply (one VPU op per vreg).
    o_ref[...] = x_ref[...] * c_ref[...]


def net_div_forward(x: jax.Array, c1: jax.Array, *, force_pallas: bool = False) -> jax.Array:
    out_shape = jnp.broadcast_shapes(x.shape, c1.shape)
    out_dtype = jnp.result_type(x.dtype, c1.dtype)
    total = int(np.prod(out_shape)) if out_shape else 1

    # Fold the constant divide into a multiply by the reciprocal (f32).
    inv_c1 = jnp.float32(1.0) / c1.astype(jnp.float32)

    # Tiny-input fast path: kernel launch overhead would dominate.
    if total <= _FAST_PATH_MAX_ELEMS and not force_pallas:
        return (x.astype(jnp.float32) * inv_c1).astype(out_dtype)

    # ---- layout plumbing (lane-dense (rows, 128) slab) ----------------------
    x_flat = jnp.broadcast_to(x, out_shape).astype(jnp.float32).reshape(-1)
    pad = (-total) % _LANES                      # pad only to whole 128-lane rows
    padded = total + pad
    rows = padded // _LANES
    if pad:
        x_flat = jnp.pad(x_flat, (0, pad))
    x2 = x_flat.reshape(rows, _LANES)

    # ---- resident-constant check --------------------------------------------
    # Strip leading 1s of C1; if out_shape ends with that core shape, the
    # flattened broadcast of 1/C1 is a pure tiling with period `period`.
    core = tuple(c1.shape)
    while core and core[0] == 1:
        core = core[1:]
    period = int(np.prod(core)) if core else 1
    resident_const = (period >= 1) and (
        len(core) == 0 or
        (len(out_shape) >= len(core) and tuple(out_shape[-len(core):]) == core)
    )

    # Row period of the constant pattern inside the (rows, 128) slab.
    if resident_const:
        row_period = max(1, period // math.gcd(period, _LANES))
        unit = math.lcm(_SUBLANES, row_period)
        if unit > _MAX_BLOCK_ROWS:               # pattern too long to keep resident
            resident_const = False
    if not resident_const:
        unit = _SUBLANES

    # ---- block sizing: big tiles, but >= 2 grid steps when possible ---------
    if rows <= unit:
        block_rows = rows                        # single block == full dim (legal)
    else:
        target = min(_MAX_BLOCK_ROWS, pl.cdiv(pl.cdiv(rows, 2), unit) * unit)
        block_rows = max(unit, target)
    grid = (pl.cdiv(rows, block_rows),)

    # ---- constant operand ----------------------------------------------------
    inv_flat = inv_c1.reshape(-1)                # length == period (leading dims are 1)
    if resident_const:
        blk_elems = block_rows * _LANES
        reps = pl.cdiv(blk_elems, period)
        c_arr = jnp.tile(inv_flat, reps)[:blk_elems].reshape(block_rows, _LANES)
        c_index_map = lambda i: (0, 0)           # DMA once, stays resident in VMEM
    else:
        # Fallback: stream the fully broadcast constant (still correct).
        c_full = jnp.broadcast_to(inv_c1, out_shape).reshape(-1)
        if pad:
            c_full = jnp.pad(c_full, (0, pad), constant_values=1.0)
        c_arr = c_full.reshape(rows, _LANES)
        c_index_map = lambda i: (i, 0)

    # ---- VMEM budget (x: 2 bufs, out: 2 bufs, const: 2 bufs) ----------------
    tile_bytes = block_rows * _LANES * 4
    vmem_limit = int(min(48 << 20, max(16 << 20, 6 * tile_bytes + (2 << 20))))

    out2 = pl.pallas_call(
        _mul_kernel,
        out_shape=jax.ShapeDtypeStruct((rows, _LANES), jnp.float32),
        grid=grid,
        in_specs=[
            pl.BlockSpec((block_rows, _LANES), lambda i: (i, 0),
                         memory_space=pltpu.MemorySpace.VMEM),
            pl.BlockSpec((block_rows, _LANES), c_index_map,
                         memory_space=pltpu.MemorySpace.VMEM),
        ],
        out_specs=pl.BlockSpec((block_rows, _LANES), lambda i: (i, 0),
                               memory_space=pltpu.MemorySpace.VMEM),
        compiler_params=pltpu.CompilerParams(
            dimension_semantics=("parallel",),
            allow_input_fusion=[True, True],
            vmem_limit_bytes=vmem_limit,
        ),
    )(x2, c_arr)

    # Undo layout plumbing (XLA fuses the slice/reshape into the consumer).
    out_flat = out2.reshape(-1)
    if pad:
        out_flat = out_flat[:total]
    return out_flat.reshape(out_shape).astype(out_dtype)


def make_constant_c1() -> jax.Array:
    # Deterministic init matching the PyTorch module:
    # rng = np.random.default_rng(seed=123); C1 = rng.random((1,2,3,3), f32) + 1.0
    rng = np.random.default_rng(seed=123)
    c1 = rng.random((1, 2, 3, 3), dtype=np.float32) + 1.0
    return jnp.asarray(c1)


if __name__ == "__main__":
    key = jax.random.PRNGKey(0)
    c1 = make_constant_c1()
    fwd = jax.jit(net_div_forward, static_argnames=("force_pallas",))

    # Small shape consistent with the module (batch=2 broadcasting over C1's
    # leading dim).  Force the Pallas path so the kernel itself is exercised.
    x = jax.random.normal(key, (2, 2, 3, 3), dtype=jnp.float32)
    out = jax.block_until_ready(fwd(x, c1, force_pallas=True))
    np.testing.assert_allclose(np.asarray(out), np.asarray(x / c1),
                               rtol=1e-6, atol=1e-6)

    # Secondary check: larger batch exercises the multi-block resident-constant
    # path (grid >= 2, ragged last block) automatically (no force needed).
    x_big = jax.random.normal(jax.random.fold_in(key, 1), (32768, 2, 3, 3),
                              dtype=jnp.float32)
    out_big = jax.block_until_ready(fwd(x_big, c1))
    np.testing.assert_allclose(np.asarray(out_big), np.asarray(x_big / c1),
                               rtol=1e-6, atol=1e-6)

    print("KERNEL_OK")
</pallas_src>

<mosaic_0001>
module attributes {stable_mosaic.version = 11 : i64} {
  func.func @_mul_kernel(%arg0: i32, %arg1: memref<1x128xf32, #tpu.memory_space<vmem>>, %arg2: memref<1x128xf32, #tpu.memory_space<vmem>>, %arg3: memref<1x128xf32, #tpu.memory_space<vmem>>) attributes {dimension_semantics = [#tpu.dimension_semantics<parallel>], iteration_bounds = array<i64: 1>, scalar_prefetch = 0 : i64, scratch_operands = 0 : i64, tpu.core_type = #tpu.core_type<tc>, window_params = [{transform_indices = @transform_0, window_bounds = array<i64: 1, 128>}, {pipeline_mode = #tpu.pipeline_mode<synchronous>, transform_indices = @transform_1, window_bounds = array<i64: 1, 128>}, {transform_indices = @transform_2, window_bounds = array<i64: 1, 128>}]} {
    %c0 = arith.constant 0 : index
    %c0_0 = arith.constant 0 : index
    %0 = vector.load %arg1[%c0, %c0_0] : memref<1x128xf32, #tpu.memory_space<vmem>>, vector<1x128xf32>
    %c0_1 = arith.constant 0 : index
    %c0_2 = arith.constant 0 : index
    %1 = vector.load %arg2[%c0_1, %c0_2] : memref<1x128xf32, #tpu.memory_space<vmem>>, vector<1x128xf32>
    %2 = arith.mulf %0, %1 : vector<1x128xf32>
    %c0_3 = arith.constant 0 : index
    %c0_4 = arith.constant 0 : index
    %3 = vector.load %arg3[%c0_3, %c0_4] : memref<1x128xf32, #tpu.memory_space<vmem>>, vector<1x128xf32>
    tpu.vector_store %arg3[%c0_3, %c0_4], %2 {strides = array<i32>} : memref<1x128xf32, #tpu.memory_space<vmem>>, vector<1x128xf32>,
    return
  }
  func.func @transform_0(%arg0: i32) -> (i32, i32) {
    %c0_i32 = arith.constant 0 : i32
    %c0_i32_0 = arith.constant 0 : i32
    return %arg0, %c0_i32 : i32, i32
  }
  func.func @transform_1(%arg0: i32) -> (i32, i32) {
    %c0_i32 = arith.constant 0 : i32
    %c0_i32_0 = arith.constant 0 : i32
    %c0_i32_1 = arith.constant 0 : i32
    return %c0_i32, %c0_i32_0 : i32, i32
  }
  func.func @transform_2(%arg0: i32) -> (i32, i32) {
    %c0_i32 = arith.constant 0 : i32
    %c0_i32_0 = arith.constant 0 : i32
    return %arg0, %c0_i32 : i32, i32
  }
}

</mosaic_0001>

<bundles_post_ra>
// kernel: tile.6
= control target key start
LH: loop header
LB: loop body
LE: loop exit
PB: predicated region body
PF: predicated region fallthrough
CT: control target
= control target key end

     0   :  { %s22_s0 = inlined_call_operand.vmem [shape: f32[18], index: 0, kind: input, shape index: {}]   ;;  %s23_s1 = inlined_call_operand.vmem [shape: f32[8,18], index: 1, kind: output, shape index: {}]  }
   0x1   :  { %v4_v0 = vld [vmem:[%s22_s0] ss:$0 sm:$0xff] }
   0x2   :  { %5 = vst [vmem:[%s23_s1] sm:$0xff] %v4_v0 }

// kernel: tile.5
= control target key start
LH: loop header
LB: loop body
LE: loop exit
PB: predicated region body
PF: predicated region fallthrough
CT: control target
= control target key end

     0   :  { %vm11_vm0 = vcmask 23552   ;;  %s56_s10 = smov 9   ;;  %s57_s11 = smov 12   ;;  %vm17_vm1 = vcmask 146552   ;;  %vm23_vm2 = vcmask 121952   ;;  %vm29_vm3 = vcmask 97352   ;;  %s79_s0 = inlined_call_operand.vmem [shape: f32[1,2,3,3], index: 0, kind: input, shape index: {}]   ;;  %s80_s1 = inlined_call_operand.vmem [shape: f32[18], index: 1, kind: output, shape index: {}]  }
   0x1   :  { %v49_v0 = vld [vmem:[%s79_s0 + $0x4] sm:$0xf]  ;;  %v8_v1 = vld [vmem:[%s79_s0] sm:$0xf]  ;;  %s55_s0 = smov 15   ;;  %s58_s12 = smov 6  }
   0x2   :  { %7 = vst [vmem:[#allocation1 + $0x8] sm:$0xf] %v49_v0  ;;  %9 = vst [vmem:[#allocation1] sm:$0xf] %v8_v1  ;;  %s59_s13 = smov 3   ;;  %vm35_vm4 = vcmask 72752  }
   0x3   :  { %vm41_vm5 = vcmask 48152  }
   0x9   :  { %v14_v2 = vld [vmem:[#allocation1 + $0xa] sm:$0x1]   ;;  %v26_v3 = vld [vmem:[#allocation1 + $0x8] sm:$0x1]   ;;  %v10_v4 = vld [vmem:[#allocation1] sm:$0x1]  }
   0xa   :  { %15 = vrot.lane.b32.xlu0 %v14_v2, %s55_s0  ;;  %27 = vrot.lane.b32.xlu1 %v26_v3, %s56_s10  ;;  %v20_v5 = vld [vmem:[#allocation1 + $0x9] sm:$0x1]   ;;  %v32_v6 = vld [vmem:[#allocation1 + $0x2] sm:$0x1]   ;;  %12 = vst.msk [vmem:[#allocation0] sm:$0x1] %vm11_vm0, %v10_v4  }
   0xb   :  { %v38_v7 = vld [vmem:[#allocation1 + $0x1] sm:$0x1]  }
   0xe   :  { %21 = vrot.lane.b32.xlu0 %v20_v5, %s57_s11  ;;  %33 = vrot.lane.b32.xlu1 %v32_v6, %s58_s12 }
  0x12   :  { %39 = vrot.lane.b32.xlu0 %v38_v7, %s59_s13 }
  0x7c   :  { %v16_v8 = vpop.permute.xlu0 %15   ;;  %v28_v9 = vpop.permute.xlu1 %27  }
  0x7d   :  { %18 = vst.msk [vmem:[#allocation0] sm:$0x1] %vm17_vm1, %v16_v8  }
  0x80   :  { %v22_v10 = vpop.permute.xlu0 %21   ;;  %v34_v11 = vpop.permute.xlu1 %33  }
  0x81   :  { %24 = vst.msk [vmem:[#allocation0] sm:$0x1] %vm23_vm2, %v22_v10  }
  0x82   :  { %30 = vst.msk [vmem:[#allocation0] sm:$0x1] %vm29_vm3, %v28_v9  }
  0x83   :  { %36 = vst.msk [vmem:[#allocation0] sm:$0x1] %vm35_vm4, %v34_v11  }
  0x84   :  { %v40_v12 = vpop.permute.xlu0 %39  }
  0x85   :  { %42 = vst.msk [vmem:[#allocation0] sm:$0x1] %vm41_vm5, %v40_v12  }
  0x8c   :  { %v46_v13 = vld [vmem:[#allocation0] sm:$0x1] }
  0x8d   :  { %48 = vst [vmem:[%s80_s1] sm:$0x1] %v46_v13 }

// kernel: tile.7
= control target key start
LH: loop header
LB: loop body
LE: loop exit
PB: predicated region body
PF: predicated region fallthrough
CT: control target
= control target key end

     0   :  { %vm9_vm0 = vcmask 15360   ;;  %s75_s12 = smov 126   ;;  %s76_s13 = smov 90   ;;  %vm3_vm1 = vcmask 146432   ;;  %vm13_vm2 = vcmask 130048   ;;  %vm16_vm3 = vcmask 1048560   ;;  %s122_s0 = inlined_call_operand.vmem [shape: f32[8,18], index: 0, kind: input, shape index: {}]   ;;  %s123_s1 = inlined_call_operand.vmem [shape: f32[144], index: 1, kind: output, shape index: {}]  }
   0x1   :  { %v60_v0 = vld [vmem:[%s122_s0 + $0x7] sm:$0x1]   ;;  %v63_v3 = vld [vmem:[%s122_s0 + $0x5] sm:$0x1]   ;;  %v62_v4 = vld [vmem:[%s122_s0 + $0x6] sm:$0x1]  }
   0x2   :  { %v61_v1 = vld [vmem:[%s122_s0 + $0x7] sm:$0x1]   ;;  %26 = vrot.lane.b32.xlu1 %v63_v3, %s76_s13  ;;  %v64_v5 = vld [vmem:[%s122_s0 + $0x4] sm:$0x1]   ;;  %v2_v6 = vld [vmem:[%s122_s0] sm:$0x1]  }
   0x3   :  { %v10_v2 = vsel %vm9_vm0, %v61_v1, %v60_v0  ;;  %4 = vst.msk [vmem:[#allocation0] sm:$0x1] %vm3_vm1, %v2_v6   ;;  %s77_s20 = smov 108   ;;  %s78_s21 = smov 72   ;;  %v65_v7 = vld [vmem:[%s122_s0 + $0x3] sm:$0x1]  }
   0x4   :  { %11 = vrot.lane.b32.xlu0 %v10_v2, %s75_s12  ;;  %v66_v8 = vld [vmem:[%s122_s0 + $0x2] sm:$0x1]   ;;  %s79_s26 = smov 54   ;;  %s80_s27 = smov 36   ;;  %v67_v9 = vld [vmem:[%s122_s0 + $0x1] sm:$0x1]  }
   0x5   :  { %s81_s0 = smov 18   ;;  %vm22_vm4 = vcmask 1032032   ;;  %vm28_vm5 = vcmask 884432   ;;  %vm34_vm6 = vcmask 736832   ;;  %vm40_vm7 = vcmask 589232  }
   0x6   :  { %32 = vrot.lane.b32.xlu1 %v64_v5, %s78_s21  ;;  %vm46_vm8 = vcmask 441632   ;;  %vm52_vm9 = vcmask 294032  }
   0x8   :  { %20 = vrot.lane.b32.xlu0 %v62_v4, %s77_s20 }
   0xa   :  { %44 = vrot.lane.b32.xlu1 %v66_v8, %s80_s27 }
   0xc   :  { %38 = vrot.lane.b32.xlu0 %v65_v7, %s79_s26 }
  0x10   :  { %50 = vrot.lane.b32.xlu0 %v67_v9, %s81_s0 }
  0x74   :  { %v27_v11 = vpop.permute.xlu1 %26  }
  0x76   :  { %v12_v10 = vpop.permute.xlu0 %11  }
  0x77   :  { %15 = vst.msk [vmem:[#allocation0 + $0x1] sm:$0x1] %vm13_vm2, %v12_v10  }
  0x78   :  { %17 = vst.msk [vmem:[#allocation0] sm:$0x1] %vm16_vm3, %v12_v10   ;;  %v33_v13 = vpop.permute.xlu1 %32  }
  0x7a   :  { %v21_v12 = vpop.permute.xlu0 %20  }
  0x7b   :  { %23 = vst.msk [vmem:[#allocation0] sm:$0x1] %vm22_vm4, %v21_v12  }
  0x7c   :  { %29 = vst.msk [vmem:[#allocation0] sm:$0x1] %vm28_vm5, %v27_v11   ;;  %v45_v15 = vpop.permute.xlu1 %44  }
  0x7d   :  { %35 = vst.msk [vmem:[#allocation0] sm:$0x1] %vm34_vm6, %v33_v13  }
  0x7e   :  { %v39_v14 = vpop.permute.xlu0 %38  }
  0x7f   :  { %41 = vst.msk [vmem:[#allocation0] sm:$0x1] %vm40_vm7, %v39_v14  }
  0x80   :  { %47 = vst.msk [vmem:[#allocation0] sm:$0x1] %vm46_vm8, %v45_v15  }
  0x82   :  { %v51_v16 = vpop.permute.xlu0 %50  }
  0x83   :  { %53 = vst.msk [vmem:[#allocation0] sm:$0x1] %vm52_vm9, %v51_v16  }
  0x8a   :  { %v57_v17 = vld [vmem:[#allocation0] sm:$0x3] }
  0x8b   :  { %59 = vst [vmem:[%s123_s1] sm:$0x3] %v57_v17 }

// kernel: net_div_forward.2
= control target key start
LH: loop header
LB: loop body
LE: loop exit
PB: predicated region body
PF: predicated region fallthrough
CT: control target
= control target key end

     0   :  { %s63_s0 = inlined_call_operand.vmem [shape: f32[36], index: 0, kind: input, shape index: {}]   ;;  %s64_s1 = inlined_call_operand.<no memory space> [shape: f32[], index: 1, kind: input, shape index: {}]   ;;  %s65_s2 = inlined_call_operand.vmem [shape: f32[144], index: 2, kind: input, shape index: {}]   ;;  %s66_s3 = inlined_call_operand.vmem [shape: f32[1,128], index: 3, kind: output, shape index: {}]  }
   0x1   :  { %v8_v0 = vstv %s64_s1 }
   0x2   :  { %v13_v1 = vld [vmem:[%s63_s0] sm:$0x1]  ;;  %v14_v2 = vlaneseq }
   0x3   :  { %v20_v3 = vld [vmem:[%s65_s2] sm:$0x3] }
   0x4   :  { %22 = vst [vmem:[#allocation13] sm:$0x1] %v20_v3  ;;  %vm16_vm0 = vcmp.lt.s32.totalorder %v14_v2, 36 }
   0x5   :  { %v17_v4 = vsel %vm16_vm0, %v13_v1, %v8_v0 }
   0x6   :  { %19 = vst [vmem:[#allocation12] sm:$0x1] %v17_v4 }
   0xb   :  { %v24_v5 = vld [vmem:[#allocation13] sm:$0x1] }
   0xd   :  { %v23_v6 = vld [vmem:[#allocation12] sm:$0x1] }
   0xe   :  { %v25_v7 = vmul.f32 %v24_v5, %v23_v6 }
  0x10   :  { %26 = vst [vmem:[%s66_s3] sm:$0x1] %v25_v7 }

</bundles_post_ra>
